<compile_context>
chip_gen: v7x
topology: tpu7x:2x2x1
jax: 0.10.0
libtpu: 0.0.40
codegen_flags: <defaults>
</compile_context>

<pallas_src>
import jax
import jax.numpy as jnp
from jax.experimental import pallas as pl
from jax.experimental.pallas import tpu as pltpu


def _make_fused_kernel(has_bias_up, has_bias_down):
    """Kernel factory: bias handling is baked in statically."""

    def kernel(*refs):
        # refs: (i_ref, x_ref, wu_ref, wd_ref, [bu_ref], [bd_ref], o_ref, acc_ref)
        x_ref, wu_ref, wd_ref = refs[1], refs[2], refs[3]
        pos = 4
        bu_ref = None
        bd_ref = None
        if has_bias_up:
            bu_ref = refs[pos]
            pos += 1
        if has_bias_down:
            bd_ref = refs[pos]
            pos += 1
        o_ref = refs[pos]
        acc_ref = refs[pos + 1]

        h = pl.program_id(1)

        @pl.when(h == 0)
        def _init():
            acc_ref[...] = jnp.zeros_like(acc_ref)

        # up = x @ W_up[i, h-block].T : contract the shared D dim directly on
        # the native (th, D) weight tile (no wrapper-side transpose).
        up = jax.lax.dot_general(
            x_ref[...], wu_ref[...],
            dimension_numbers=(((1,), (1,)), ((), ())),
            preferred_element_type=jnp.float32)
        if has_bias_up:
            up = up + bu_ref[...].astype(jnp.float32)
        up = up.astype(wd_ref.dtype)  # match the module's dtype chain

        # down partial sum over this H block: up @ W_down[i, h-block]
        acc_ref[...] += jax.lax.dot_general(
            up, wd_ref[...],
            dimension_numbers=(((1,), (0,)), ((), ())),
            preferred_element_type=jnp.float32)

        @pl.when(h == pl.num_programs(1) - 1)
        def _finalize():
            out = acc_ref[...]
            if has_bias_down:
                out = out + bd_ref[...].astype(jnp.float32)
            o_ref[...] = out.astype(o_ref.dtype)

    return kernel


def _pick_tile(dim, target, align):
    """Largest divisor of `dim` that is a multiple of `align` and <= target.

    Falls back to the full dim (always a legal block: block == array dim)."""
    t = min(target, dim)
    start = t - (t % align)
    for cand in range(start, 0, -align):
        if dim % cand == 0:
            return cand
    return dim


def _fit_tiles(M, H, D, x_bytes, w_bytes, o_bytes, has_bias,
               tm_target, th_target, budget):
    """Pick (tm, th) under a VMEM footprint budget; return footprint too."""
    tm = _pick_tile(M, tm_target, 8)      # sublane-aligned
    th = _pick_tile(H, th_target, 128)    # lane-aligned (also bias lane dim)

    def footprint(tm_, th_):
        fp = 2 * tm_ * D * x_bytes          # x tile, double-buffered
        fp += 2 * 2 * th_ * D * w_bytes     # W_up + W_down tiles, double-buffered
        fp += 2 * tm_ * D * o_bytes         # output tile, double-buffered
        fp += tm_ * D * 4                   # fp32 accumulator scratch
        if has_bias:
            fp += 2 * (th_ + D) * 4         # bias tiles (upper bound)
        return fp

    while footprint(tm, th) > budget:
        new_th = _pick_tile(H, th // 2, 128)
        if 0 < new_th < th:
            th = new_th
            continue
        new_tm = _pick_tile(M, tm // 2, 8)
        if 0 < new_tm < tm:
            tm = new_tm
            continue
        break
    return tm, th, footprint(tm, th)


def linear_glu_experts_forward(x, weight_up, weight_down, bias_up, bias_down,
                               expert_index, *, tm_target=256, th_target=512,
                               vmem_budget_bytes=32 * 1024 * 1024):
    """Pallas implementation of LinearGLUExperts.forward(input, i).

    x:            (..., in_features)
    weight_up:    (E, hidden_features, in_features)   -- native PyTorch layout
    weight_down:  (E, hidden_features, in_features)
    bias_up:      (E, hidden_features) or None
    bias_down:    (E, in_features)     or None
    expert_index: python int / int32 scalar.

    Compute dtype == weight storage dtype (store weights in bf16 upstream for
    bf16 MXU peak); accumulation is fp32; output dtype matches x.dtype.
    """
    E, H, D = weight_up.shape
    assert weight_down.shape == (E, H, D)
    assert x.shape[-1] == D
    lead = x.shape[:-1]
    out_dtype = x.dtype

    cdt = weight_up.dtype          # compute dtype = weight storage dtype
    x2 = x.reshape(-1, D)
    if x2.dtype != cdt:
        x2 = x2.astype(cdt)        # activations only (cheap vs. E experts' weights)
    M = x2.shape[0]

    has_bias_up = bias_up is not None
    has_bias_down = bias_down is not None

    x_bytes = jnp.dtype(cdt).itemsize
    w_bytes = jnp.dtype(weight_up.dtype).itemsize
    o_bytes = jnp.dtype(out_dtype).itemsize
    tm, th, footprint = _fit_tiles(M, H, D, x_bytes, w_bytes, o_bytes,
                                   has_bias_up or has_bias_down,
                                   tm_target, th_target, vmem_budget_bytes)
    grid = (M // tm, H // th)

    idx = jnp.asarray(expert_index, dtype=jnp.int32).reshape((1,))

    in_specs = [
        # activation tile (tm, D): resident across the whole H reduction
        pl.BlockSpec((tm, D), lambda m, h, i: (m, 0)),
        # selected expert's W_up tile (th, D) in native layout
        pl.BlockSpec((pl.Squeezed(), th, D), lambda m, h, i: (i[0], h, 0)),
        # selected expert's W_down tile (th, D) in native layout
        pl.BlockSpec((pl.Squeezed(), th, D), lambda m, h, i: (i[0], h, 0)),
    ]
    args = [x2, weight_up, weight_down]
    if has_bias_up:
        in_specs.append(pl.BlockSpec((pl.Squeezed(), 1, th),
                                     lambda m, h, i: (i[0], 0, h)))
        args.append(bias_up.reshape(E, 1, H))
    if has_bias_down:
        in_specs.append(pl.BlockSpec((pl.Squeezed(), 1, D),
                                     lambda m, h, i: (i[0], 0, 0)))
        args.append(bias_down.reshape(E, 1, D))

    cost = pl.CostEstimate(
        flops=4 * M * H * D,               # 2 GEMMs of 2*M*H*D each
        transcendentals=0,
        bytes_accessed=(M * D * (x_bytes + o_bytes)
                        + 2 * H * D * w_bytes * grid[0]   # selected expert only
                        + (H * 4 if has_bias_up else 0)
                        + (D * 4 if has_bias_down else 0)),
    )

    # Footprint-derived scoped VMEM limit, capped at v7x's 64 MiB physical VMEM.
    vmem_limit = int(min(64 * 1024 * 1024,
                         max(16 * 1024 * 1024,
                             2 * footprint + 4 * 1024 * 1024)))

    out = pl.pallas_call(
        _make_fused_kernel(has_bias_up, has_bias_down),
        out_shape=jax.ShapeDtypeStruct((M, D), out_dtype),
        grid_spec=pltpu.PrefetchScalarGridSpec(
            num_scalar_prefetch=1,
            grid=grid,
            in_specs=in_specs,
            out_specs=pl.BlockSpec((tm, D), lambda m, h, i: (m, 0)),
            scratch_shapes=[pltpu.VMEM((tm, D), jnp.float32)],
        ),
        compiler_params=pltpu.CompilerParams(
            dimension_semantics=("parallel", "arbitrary"),
            vmem_limit_bytes=vmem_limit,
        ),
        cost_estimate=cost,
    )(idx, *args)

    return out.reshape(*lead, D)


def _reference_forward(x, weight_up, weight_down, bias_up, bias_down, i):
    """Plain-JAX reference mirroring the PyTorch forward (and the cast path)."""
    cdt = weight_up.dtype
    D = x.shape[-1]
    x2 = x.reshape(-1, D).astype(cdt)
    up = jnp.dot(x2, weight_up[i].T, preferred_element_type=jnp.float32)
    if bias_up is not None:
        up = up + bias_up[i].astype(jnp.float32)
    up = up.astype(cdt)
    down = jnp.dot(up, weight_down[i], preferred_element_type=jnp.float32)
    if bias_down is not None:
        down = down + bias_down[i].astype(jnp.float32)
    return down.reshape(*x.shape[:-1], D).astype(x.dtype)


if __name__ == "__main__":
    key = jax.random.PRNGKey(0)
    k_x, k_wu, k_wd, k_bu, k_bd = jax.random.split(key, 5)

    # Small, forward-implied shapes: batch=2, seq=8, in_features=128,
    # hidden_features=256, num_experts=4.
    B, S, D, H, E = 2, 8, 128, 256, 4
    expert_i = 1

    x = jax.random.normal(k_x, (B, S, D), dtype=jnp.float32)
    weight_up = jax.random.normal(k_wu, (E, H, D), dtype=jnp.float32) * 0.05
    weight_down = jax.random.normal(k_wd, (E, H, D), dtype=jnp.float32) * 0.05
    bias_up = jax.random.normal(k_bu, (E, H), dtype=jnp.float32) * 0.01
    bias_down = jax.random.normal(k_bd, (E, D), dtype=jnp.float32) * 0.01

    # fp32 path (weights stored fp32; compute dtype = weight dtype).
    y = linear_glu_experts_forward(x, weight_up, weight_down, bias_up,
                                   bias_down, expert_i)
    y = jax.block_until_ready(y)
    y_ref = _reference_forward(x, weight_up, weight_down, bias_up, bias_down,
                               expert_i)
    assert y.shape == (B, S, D)
    assert jnp.allclose(y, y_ref, atol=2e-2, rtol=2e-2), "fp32 mismatch"

    # bias=False path: epilogue adds are statically skipped, no zero tensors.
    y_nb = linear_glu_experts_forward(x, weight_up, weight_down, None, None,
                                      expert_i)
    y_nb = jax.block_until_ready(y_nb)
    y_nb_ref = _reference_forward(x, weight_up, weight_down, None, None,
                                  expert_i)
    assert jnp.allclose(y_nb, y_nb_ref, atol=2e-2, rtol=2e-2), "no-bias mismatch"

    # bf16 path: weights stored in bf16 once (upstream), no per-call cast;
    # halves weight HBM traffic and runs the MXU at bf16 rate (fp32 acc).
    wu_bf = weight_up.astype(jnp.bfloat16)
    wd_bf = weight_down.astype(jnp.bfloat16)
    x_bf = x.astype(jnp.bfloat16)
    y_bf = linear_glu_experts_forward(x_bf, wu_bf, wd_bf, bias_up, bias_down,
                                      expert_i)
    y_bf = jax.block_until_ready(y_bf)
    y_bf_ref = _reference_forward(x_bf, wu_bf, wd_bf, bias_up, bias_down,
                                  expert_i)
    assert jnp.allclose(y_bf.astype(jnp.float32), y_bf_ref.astype(jnp.float32),
                        atol=5e-2, rtol=5e-2), "bf16 mismatch"

    print("KERNEL_OK")
</pallas_src>

<mosaic_0001>
module attributes {stable_mosaic.version = 11 : i64} {
  func.func @kernel(%arg0: i32, %arg1: i32, %arg2: memref<1xi32, #tpu.memory_space<smem>>, %arg3: memref<16x128xf32, #tpu.memory_space<vmem>>, %arg4: memref<1x256x128xf32, #tpu.memory_space<vmem>>, %arg5: memref<1x256x128xf32, #tpu.memory_space<vmem>>, %arg6: memref<1x1x256xf32, #tpu.memory_space<vmem>>, %arg7: memref<1x1x128xf32, #tpu.memory_space<vmem>>, %arg8: memref<16x128xf32, #tpu.memory_space<vmem>>, %arg9: memref<16x128xf32, #tpu.memory_space<vmem>>) attributes {dimension_semantics = [#tpu.dimension_semantics<parallel>, #tpu.dimension_semantics<arbitrary>], iteration_bounds = array<i64: 1, 1>, scalar_prefetch = 1 : i64, scratch_operands = 1 : i64, tpu.core_type = #tpu.core_type<tc>, window_params = [{transform_indices = @transform_0, window_bounds = array<i64: 16, 128>}, {transform_indices = @transform_1, window_bounds = array<i64: 1, 256, 128>}, {transform_indices = @transform_2, window_bounds = array<i64: 1, 256, 128>}, {transform_indices = @transform_3, window_bounds = array<i64: 1, 1, 256>}, {transform_indices = @transform_4, window_bounds = array<i64: 1, 1, 128>}, {transform_indices = @transform_5, window_bounds = array<i64: 16, 128>}]} {
    %c0_i32 = arith.constant 0 : i32
    %0 = arith.cmpi eq, %arg1, %c0_i32 : i32
    %1 = arith.extui %0 : i1 to i32
    %c0_i32_0 = arith.constant 0 : i32
    %2 = arith.cmpi ne, %1, %c0_i32_0 : i32
    scf.if %2 {
      %cst_18 = arith.constant 0.000000e+00 : f32
      %20 = vector.broadcast %cst_18 : f32 to vector<16x128xf32>
      %c0_19 = arith.constant 0 : index
      %c0_20 = arith.constant 0 : index
      %21 = vector.load %arg9[%c0_19, %c0_20] : memref<16x128xf32, #tpu.memory_space<vmem>>, vector<16x128xf32>
      tpu.vector_store %arg9[%c0_19, %c0_20], %20 {strides = array<i32>} : memref<16x128xf32, #tpu.memory_space<vmem>>, vector<16x128xf32>,
    } else {
    }
    %c0 = arith.constant 0 : index
    %c0_1 = arith.constant 0 : index
    %3 = vector.load %arg3[%c0, %c0_1] : memref<16x128xf32, #tpu.memory_space<vmem>>, vector<16x128xf32>
    %c0_2 = arith.constant 0 : index
    %c0_3 = arith.constant 0 : index
    %c0_4 = arith.constant 0 : index
    %4 = vector.load %arg4[%c0_2, %c0_3, %c0_4] : memref<1x256x128xf32, #tpu.memory_space<vmem>>, vector<1x256x128xf32>
    %5 = vector.shape_cast %4 : vector<1x256x128xf32> to vector<256x128xf32>
    %cst = arith.constant dense<0.000000e+00> : vector<16x256xf32>
    %6 = tpu.matmul %3, %5, %cst {dimension_numbers = #tpu.dot_dimension_numbers<[1], [1], [0], [0], [0, 0, 1, 0], [], []>} : vector<16x128xf32>, vector<256x128xf32>, vector<16x256xf32> -> vector<16x256xf32>
    %c0_5 = arith.constant 0 : index
    %c0_6 = arith.constant 0 : index
    %c0_7 = arith.constant 0 : index
    %7 = vector.load %arg6[%c0_5, %c0_6, %c0_7] : memref<1x1x256xf32, #tpu.memory_space<vmem>>, vector<1x1x256xf32>
    %8 = vector.shape_cast %7 : vector<1x1x256xf32> to vector<1x256xf32>
    %9 = vector.broadcast %8 : vector<1x256xf32> to vector<16x256xf32>
    %10 = arith.addf %6, %9 : vector<16x256xf32>
    %c0_8 = arith.constant 0 : index
    %c0_9 = arith.constant 0 : index
    %11 = vector.load %arg9[%c0_8, %c0_9] : memref<16x128xf32, #tpu.memory_space<vmem>>, vector<16x128xf32>
    %c0_10 = arith.constant 0 : index
    %c0_11 = arith.constant 0 : index
    %c0_12 = arith.constant 0 : index
    %12 = vector.load %arg5[%c0_10, %c0_11, %c0_12] : memref<1x256x128xf32, #tpu.memory_space<vmem>>, vector<1x256x128xf32>
    %13 = vector.shape_cast %12 : vector<1x256x128xf32> to vector<256x128xf32>
    %cst_13 = arith.constant dense<0.000000e+00> : vector<16x128xf32>
    %14 = tpu.matmul %10, %13, %cst_13 {dimension_numbers = #tpu.dot_dimension_numbers<[1], [0], [0], [1], [0, 0, 1, 1], [], []>} : vector<16x256xf32>, vector<256x128xf32>, vector<16x128xf32> -> vector<16x128xf32>
    %15 = arith.addf %11, %14 : vector<16x128xf32>
    %c0_14 = arith.constant 0 : index
    %c0_15 = arith.constant 0 : index
    %16 = vector.load %arg9[%c0_14, %c0_15] : memref<16x128xf32, #tpu.memory_space<vmem>>, vector<16x128xf32>
    tpu.vector_store %arg9[%c0_14, %c0_15], %15 {strides = array<i32>} : memref<16x128xf32, #tpu.memory_space<vmem>>, vector<16x128xf32>,
    %c0_i32_16 = arith.constant 0 : i32
    %17 = arith.cmpi eq, %arg1, %c0_i32_16 : i32
    %18 = arith.extui %17 : i1 to i32
    %c0_i32_17 = arith.constant 0 : i32
    %19 = arith.cmpi ne, %18, %c0_i32_17 : i32
    scf.if %19 {
      %c0_18 = arith.constant 0 : index
      %c0_19 = arith.constant 0 : index
      %20 = vector.load %arg9[%c0_18, %c0_19] : memref<16x128xf32, #tpu.memory_space<vmem>>, vector<16x128xf32>
      %c0_20 = arith.constant 0 : index
      %c0_21 = arith.constant 0 : index
      %c0_22 = arith.constant 0 : index
      %21 = vector.load %arg7[%c0_20, %c0_21, %c0_22] : memref<1x1x128xf32, #tpu.memory_space<vmem>>, vector<1x1x128xf32>
      %22 = vector.shape_cast %21 : vector<1x1x128xf32> to vector<1x128xf32>
      %23 = vector.broadcast %22 : vector<1x128xf32> to vector<16x128xf32>
      %24 = arith.addf %20, %23 : vector<16x128xf32>
      %c0_23 = arith.constant 0 : index
      %c0_24 = arith.constant 0 : index
      %25 = vector.load %arg8[%c0_23, %c0_24] : memref<16x128xf32, #tpu.memory_space<vmem>>, vector<16x128xf32>
      tpu.vector_store %arg8[%c0_23, %c0_24], %24 {strides = array<i32>} : memref<16x128xf32, #tpu.memory_space<vmem>>, vector<16x128xf32>,
    } else {
    }
    return
  }
  func.func @transform_0(%arg0: i32, %arg1: i32, %arg2: memref<1xi32, #tpu.memory_space<smem>>) -> (i32, i32) {
    %c0_i32 = arith.constant 0 : i32
    %c0_i32_0 = arith.constant 0 : i32
    return %arg0, %c0_i32 : i32, i32
  }
  func.func @transform_1(%arg0: i32, %arg1: i32, %arg2: memref<1xi32, #tpu.memory_space<smem>>) -> (i32, i32, i32) {
    %c0 = arith.constant 0 : index
    %0 = memref.load %arg2[%c0] : memref<1xi32, #tpu.memory_space<smem>>
    %c0_i32 = arith.constant 0 : i32
    %c0_i32_0 = arith.constant 0 : i32
    return %0, %arg1, %c0_i32 : i32, i32, i32
  }
  func.func @transform_2(%arg0: i32, %arg1: i32, %arg2: memref<1xi32, #tpu.memory_space<smem>>) -> (i32, i32, i32) {
    %c0 = arith.constant 0 : index
    %0 = memref.load %arg2[%c0] : memref<1xi32, #tpu.memory_space<smem>>
    %c0_i32 = arith.constant 0 : i32
    %c0_i32_0 = arith.constant 0 : i32
    return %0, %arg1, %c0_i32 : i32, i32, i32
  }
  func.func @transform_3(%arg0: i32, %arg1: i32, %arg2: memref<1xi32, #tpu.memory_space<smem>>) -> (i32, i32, i32) {
    %c0 = arith.constant 0 : index
    %0 = memref.load %arg2[%c0] : memref<1xi32, #tpu.memory_space<smem>>
    %c0_i32 = arith.constant 0 : i32
    %c0_i32_0 = arith.constant 0 : i32
    return %0, %c0_i32, %arg1 : i32, i32, i32
  }
  func.func @transform_4(%arg0: i32, %arg1: i32, %arg2: memref<1xi32, #tpu.memory_space<smem>>) -> (i32, i32, i32) {
    %c0 = arith.constant 0 : index
    %0 = memref.load %arg2[%c0] : memref<1xi32, #tpu.memory_space<smem>>
    %c0_i32 = arith.constant 0 : i32
    %c0_i32_0 = arith.constant 0 : i32
    %c0_i32_1 = arith.constant 0 : i32
    return %0, %c0_i32, %c0_i32_0 : i32, i32, i32
  }
  func.func @transform_5(%arg0: i32, %arg1: i32, %arg2: memref<1xi32, #tpu.memory_space<smem>>) -> (i32, i32) {
    %c0_i32 = arith.constant 0 : i32
    %c0_i32_0 = arith.constant 0 : i32
    return %arg0, %c0_i32 : i32, i32
  }
}

</mosaic_0001>

<bundles_post_ra>
// kernel: tpu_custom_call.1
= control target key start
LH: loop header
LB: loop body
LE: loop exit
PB: predicated region body
PF: predicated region fallthrough
CT: control target
= control target key end

     0   :  { %12 = vsyncpa [#allocation6], 0  ;;  %s772_s0 = inlined_call_operand.<no memory space> [shape: s32[1], index: 0, kind: input, shape index: {}]   ;;  %s773_s1 = inlined_call_operand.hbm [shape: f32[16,128], index: 1, kind: input, shape index: {}]   ;;  %s774_s2 = inlined_call_operand.hbm [shape: f32[4,256,128], index: 2, kind: input, shape index: {}]   ;;  %s775_s3 = inlined_call_operand.hbm [shape: f32[4,256,128], index: 3, kind: input, shape index: {}]   ;;  %s776_s4 = inlined_call_operand.vmem [shape: f32[4,1,256], index: 4, kind: input, shape index: {}]   ;;  %s777_s5 = inlined_call_operand.vmem [shape: f32[4,1,128], index: 5, kind: input, shape index: {}]   ;;  %s778_s6 = inlined_call_operand.hbm [shape: f32[16,128], index: 6, kind: output, shape index: {}]  }
   0x1   :  { %13 = vsyncpa [#allocation9], 0 }
   0x2   :  { %14 = vsyncpa [#allocation7], 0  ;;  %s400_s23 = sshll.u32 %s772_s0, 12  ;;  %s644_s27 = smov [#allocation8]  }
   0x3   :  { %s35_s26 = scalar_lea.hbm %s774_s2, %s400_s23  ;;  %s36_s28 = sshll.u32 %s644_s27, 4  ;;  %s37_s28 = int_to_ptr.vmem [resolvable:$true] %s36_s28 }
   0x4   :  { %s694_s7 = scalar_lea.hbm %s775_s3, %s400_s23  ;;  %s546_s8 = scalar_lea.hbm %s35_s26, 4096 }
   0x5   :  { %p547_p0 = scmp.ne.s32.totalorder %s35_s26, %s546_s8  ;;  %s548_s11 = scalar_lea.hbm %s774_s2, 16384 }
   0x6   :  { %p549_p1 = scmp.lt.u32.totalorder %s35_s26, %s774_s2  ;;  %p550_p2 = scmp.lt.u32.totalorder %s548_s11, %s546_s8 }
   0x7   :  { %p552_p4 = scmp.lt.u32.totalorder %s546_s8, %s35_s26 }
   0x8   :  { %p551_p3 = por %p550_p2, %p549_p1 }
   0xa   :  { %p553_p5 = por %p552_p4, %p551_p3 }
   0xc   :  { %p554_p6 = pnand %p553_p5, %p547_p0 }
   0xe   :  { %557 = shalt.err (!%p554_p6)
}
   0xf   :  { %s558_s14 = scalar_lea.vmem %s37_s28, 4096  ;;  %p563_p8 = scmp.lt.s32.totalorder %s37_s28, %s37_s28 }
  0x10   :  { %p559_p7 = scmp.ne.s32.totalorder %s37_s28, %s558_s14  ;;  %p564_p9 = scmp.lt.s32.totalorder %s558_s14, %s558_s14 }
  0x12   :  { %p565_p10 = por %p564_p9, %p563_p8 }
  0x14   :  { %p566_p11 = pnand %p565_p10, %p559_p7 }
  0x16   :  { %569 = shalt.err (!%p566_p11)
}
  0x17   :  { %s645_s15 = smov 128   ;;  %s646_s16 = smov 8  }
  0x18   :  { %42 = dma.hbm_to_vmem [thread:$0]  %s35_s26, 4096, %s37_s28, [#allocation9], %s645_s15, %s645_s15, %s646_s16  }
  0x19   :  { %s647_s2 = smov [#allocation5]   ;;  %s648_s18 = smov [#allocation10]  }
  0x1a   :  { %s20_s17 = sshll.u32 %s647_s2, 4  ;;  %s52_s19 = sshll.u32 %s648_s18, 4  ;;  %s21_s17 = int_to_ptr.vmem [resolvable:$true] %s20_s17  ;;  %s705_s19 = int_to_ptr.vmem [resolvable:$true] %s52_s19 }
  0x1b   :  { %s570_s22 = scalar_lea.hbm %s773_s1, 256 }
  0x1c   :  { %p571_p12 = scmp.ne.s32.totalorder %s773_s1, %s570_s22  ;;  %p574_p13 = scmp.lt.u32.totalorder %s570_s22, %s773_s1 }
  0x1e   :  { %p576_p0 = pnand %p574_p13, %p571_p12 }
  0x20   :  { %579 = shalt.err (!%p576_p0)
}
  0x21   :  { %s580_s26 = scalar_lea.vmem %s21_s17, 256  ;;  %p585_p2 = scmp.lt.s32.totalorder %s21_s17, %s21_s17 }
  0x22   :  { %p581_p1 = scmp.ne.s32.totalorder %s21_s17, %s580_s26  ;;  %p586_p3 = scmp.lt.s32.totalorder %s580_s26, %s580_s26 }
  0x24   :  { %p587_p4 = por %p586_p3, %p585_p2 }
  0x26   :  { %p588_p5 = pnand %p587_p4, %p581_p1 }
  0x28   :  { %591 = shalt.err (!%p588_p5)
}
  0x29   :  { %26 = dma.hbm_to_vmem [thread:$0]  %s773_s1, 256, %s21_s17, [#allocation6], %s645_s15, %s645_s15, %s646_s16  }
  0x2a   :  { %s592_s30 = scalar_lea.hbm %s694_s7, 4096  ;;  %s594_s10 = scalar_lea.hbm %s775_s3, 16384 }
  0x2b   :  { %p593_p6 = scmp.ne.s32.totalorder %s694_s7, %s592_s30  ;;  %p595_p7 = scmp.lt.u32.totalorder %s694_s7, %s775_s3 }
  0x2c   :  { %p596_p8 = scmp.lt.u32.totalorder %s594_s10, %s592_s30  ;;  %p598_p10 = scmp.lt.u32.totalorder %s592_s30, %s694_s7 }
  0x2e   :  { %p597_p9 = por %p596_p8, %p595_p7 }
  0x30   :  { %p599_p11 = por %p598_p10, %p597_p9 }
  0x32   :  { %p600_p12 = pnand %p599_p11, %p593_p6 }
  0x34   :  { %603 = shalt.err (!%p600_p12)
}
  0x35   :  { %s604_s1 = scalar_lea.vmem %s705_s19, 4096  ;;  %p609_p0 = scmp.lt.s32.totalorder %s705_s19, %s705_s19 }
  0x36   :  { %p605_p13 = scmp.ne.s32.totalorder %s705_s19, %s604_s1  ;;  %p610_p1 = scmp.lt.s32.totalorder %s604_s1, %s604_s1 }
  0x38   :  { %p611_p2 = por %p610_p1, %p609_p0 }
  0x3a   :  { %p612_p3 = pnand %p611_p2, %p605_p13 }
  0x3c   :  { %615 = shalt.err (!%p612_p3)
}
  0x3d   :  { %58 = dma.hbm_to_vmem [thread:$0]  %s694_s7, 4096, %s705_s19, [#allocation9], %s645_s15, %s645_s15, %s646_s16  }
  0x3e   :  { %638 = dma.done.wait [#allocation6], 256  }
  0x3f   :  { %639 = vsyncadd [#allocation6], 4294967040 }
  0x40   :  { %640 = dma.done.wait [#allocation9], 8192  }
  0x41   :  { %641 = vsyncadd [#allocation9], 4294959104  ;;  %v129_v0 = vld [vmem:[#allocation8 + $0x80] sm:$0xff]  ;;  %v130_v1 = vld [vmem:[#allocation8 + $0x88] sm:$0xff]  ;;  %p95_p4 = scmp.lt.s32.totalorder %s772_s0, 3  ;;  %s649_s22 = smov [#allocation11]  }
  0x42   :  { %v113_v2 = vld [vmem:[#allocation8] sm:$0xff]  ;;  %v476_v3 = vpack.c.bf16 %v130_v1, %v129_v0  ;;  %v114_v4 = vld [vmem:[#allocation8 + $0x8] sm:$0xff]  ;;  %v131_v5 = vld [vmem:[#allocation8 + $0x90] sm:$0xff]  ;;  %s368_s23 = sshll.u32 %s649_s22, 4  ;;  %s369_s23 = int_to_ptr.vmem [resolvable:$true] %s368_s23 }
  0x43   :  { %v132_v6 = vld [vmem:[#allocation8 + $0x98] sm:$0xff]  ;;  %v478_v7 = vpack.c.bf16 %v114_v4, %v113_v2  ;;  %v115_v9 = vld [vmem:[#allocation8 + $0x10] sm:$0xff]  ;;  %v133_v11 = vld [vmem:[#allocation8 + $0xa0] sm:$0xff]  ;;  %s780_s0 = smov (!%p95_p4, %s772_s0), 3  ;;  %s616_s24 = scalar_lea.vmem %s369_s23, 256 }
  0x44   :  { %v480_v8 = vpack.c.bf16 %v132_v6, %v131_v5  ;;  %477 = vmatprep.subr.bf16.mxu0 %v476_v3  ;;  %v116_v10 = vld [vmem:[#allocation8 + $0x18] sm:$0xff]  ;;  %v134_v12 = vld [vmem:[#allocation8 + $0xa8] sm:$0xff]  ;;  %v741_v15 = vld [vmem:[#allocation5] sm:$0xff]  ;;  %s398_s2 = sshll.u32 %s780_s0, 1  ;;  %p617_p5 = scmp.ne.s32.totalorder %s369_s23, %s616_s24 }
  0x45   :  { %479 = vmatpush3.bf16.xpose.msra.mxu0 %v478_v7  ;;  %v482_v13 = vpack.c.bf16 %v116_v10, %v115_v9  ;;  %v484_v14 = vpack.c.bf16 %v134_v12, %v133_v11  ;;  %v117_v16 = vld [vmem:[#allocation8 + $0x20] sm:$0xff]  ;;  %v118_v17 = vld [vmem:[#allocation8 + $0x28] sm:$0xff]  ;;  %434 = vmatprep.mubr.f32.mxu0 %v741_v15  ;;  %v135_v20 = vld [vmem:[#allocation8 + $0xb0] sm:$0xff]  ;;  %s98_s19 = scalar_lea.vmem %s776_s4, %s398_s2  ;;  %s103_s4 = scalar_lea.vmem %s777_s5, %s780_s0 }
  0x46   :  { %481 = vmatprep.subr.bf16.mxu0 %v480_v8  ;;  %v252_v18 = vld [vmem:[#allocation10 + $0x80] sm:$0xff]  ;;  %v253_v19 = vld [vmem:[#allocation10 + $0x88] sm:$0xff]  ;;  %v254_v24 = vld [vmem:[#allocation10 + $0x90] sm:$0xff]  ;;  %v486_v34 = vpack.c.bf16 %v118_v17, %v117_v16  ;;  %p621_p6 = scmp.lt.s32.totalorder %s369_s23, %s369_s23  ;;  %p622_p7 = scmp.lt.s32.totalorder %s616_s24, %s616_s24 }
  0x47   :  { %v508_v21 = vpack.c.bf16 %v253_v19, %v252_v18  ;;  %v236_v22 = vld [vmem:[#allocation10] sm:$0xff]  ;;  %v237_v23 = vld [vmem:[#allocation10 + $0x8] sm:$0xff]  ;;  %v255_v26 = vld [vmem:[#allocation10 + $0x98] sm:$0xff] }
  0x48   :  { %v510_v25 = vpack.c.bf16 %v237_v23, %v236_v22  ;;  %v238_v27 = vld [vmem:[#allocation10 + $0x10] sm:$0xff]  ;;  %v239_v28 = vld [vmem:[#allocation10 + $0x18] sm:$0xff]  ;;  %v512_v30 = vpack.c.bf16 %v255_v26, %v254_v24  ;;  %v256_v31 = vld [vmem:[#allocation10 + $0xa0] sm:$0xff]  ;;  %p623_p8 = por %p622_p7, %p621_p6 }
  0x49   :  { %v136_v29 = vld [vmem:[#allocation8 + $0xb8] sm:$0xff]  ;;  %509 = vmatprep.subr.bf16.mxu1 %v508_v21  ;;  %v257_v32 = vld [vmem:[#allocation10 + $0xa8] sm:$0xff]  ;;  %v514_v33 = vpack.c.bf16 %v239_v28, %v238_v27  ;;  %v240_v36 = vld [vmem:[#allocation10 + $0x20] sm:$0xff] }
  0x4a   :  { %511 = vmatpush3.bf16.msra.mxu1 %v510_v25  ;;  %v516_v35 = vpack.c.bf16 %v257_v32, %v256_v31  ;;  %v241_v37 = vld [vmem:[#allocation10 + $0x28] sm:$0xff]  ;;  %v488_v38 = vpack.c.bf16 %v136_v29, %v135_v20  ;;  %v258_v39 = vld [vmem:[#allocation10 + $0xb0] sm:$0xff]  ;;  %v259_v40 = vld [vmem:[#allocation10 + $0xb8] sm:$0xff]  ;;  %p624_p9 = pnand %p623_p8, %p617_p5 }
  0x4b   :  { %513 = vmatprep.subr.bf16.mxu1 %v512_v30  ;;  %v518_v41 = vpack.c.bf16 %v241_v37, %v240_v36  ;;  %v119_v42 = vld [vmem:[#allocation8 + $0x30] sm:$0xff]  ;;  %v520_v43 = vpack.c.bf16 %v259_v40, %v258_v39  ;;  %v243_v45 = vld [vmem:[#allocation10 + $0x38] sm:$0xff]  ;;  %v260_v47 = vld [vmem:[#allocation10 + $0xc0] sm:$0xff] }
  0x4c   :  { %v242_v44 = vld [vmem:[#allocation10 + $0x30] sm:$0xff]  ;;  %v120_v46 = vld [vmem:[#allocation8 + $0x38] sm:$0xff]  ;;  %v261_v48 = vld [vmem:[#allocation10 + $0xc8] sm:$0xff] }
  0x4d   :  { %483 = vmatpush3.bf16.xpose.msra.mxu0 %v482_v13  ;;  %v137_v49 = vld [vmem:[#allocation8 + $0xc0] sm:$0xff]  ;;  %v138_v50 = vld [vmem:[#allocation8 + $0xc8] sm:$0xff]  ;;  %v522_v51 = vpack.c.bf16 %v243_v45, %v242_v44  ;;  %v490_v52 = vpack.c.bf16 %v120_v46, %v119_v42  ;;  %v524_v53 = vpack.c.bf16 %v261_v48, %v260_v47  ;;  %v262_v57 = vld [vmem:[#allocation10 + $0xd0] sm:$0xff] }
  0x4e   :  { %485 = vmatprep.subr.bf16.mxu0 %v484_v14  ;;  %515 = vmatpush3.bf16.msra.mxu1 %v514_v33  ;;  %v244_v54 = vld [vmem:[#allocation10 + $0x40] sm:$0xff]  ;;  %v245_v55 = vld [vmem:[#allocation10 + $0x48] sm:$0xff]  ;;  %v492_v56 = vpack.c.bf16 %v138_v50, %v137_v49  ;;  %v263_v58 = vld [vmem:[#allocation10 + $0xd8] sm:$0xff] }
  0x4f   :  { %517 = vmatprep.subr.bf16.mxu1 %v516_v35  ;;  %v526_v59 = vpack.c.bf16 %v245_v55, %v244_v54  ;;  %v121_v60 = vld [vmem:[#allocation8 + $0x40] sm:$0xff]  ;;  %v528_v61 = vpack.c.bf16 %v263_v58, %v262_v57  ;;  %v246_v62 = vld [vmem:[#allocation10 + $0x50] sm:$0xff]  ;;  %v247_v63 = vld [vmem:[#allocation10 + $0x58] sm:$0xff]  ;;  %v147_v35 = vlaneseq }
  0x50   :  { %v122_v0 = vld [vmem:[#allocation8 + $0x48] sm:$0xff]  ;;  %v264_v1 = vld [vmem:[#allocation10 + $0xe0] sm:$0xff]  ;;  %v139_v3 = vld [vmem:[#allocation8 + $0xd0] sm:$0xff]  ;;  %v530_v5 = vpack.c.bf16 %v247_v63, %v246_v62 }
  0x51   :  { %v265_v2 = vld [vmem:[#allocation10 + $0xe8] sm:$0xff]  ;;  %v140_v4 = vld [vmem:[#allocation8 + $0xd8] sm:$0xff]  ;;  %v494_v6 = vpack.c.bf16 %v122_v0, %v121_v60  ;;  %v248_v8 = vld [vmem:[#allocation10 + $0x60] sm:$0xff] }
  0x52   :  { %519 = vmatpush3.bf16.msra.mxu1 %v518_v41  ;;  %v532_v7 = vpack.c.bf16 %v265_v2, %v264_v1  ;;  %v249_v9 = vld [vmem:[#allocation10 + $0x68] sm:$0xff]  ;;  %v496_v10 = vpack.c.bf16 %v140_v4, %v139_v3  ;;  %v123_v12 = vld [vmem:[#allocation8 + $0x50] sm:$0xff]  ;;  %v124_v13 = vld [vmem:[#allocation8 + $0x58] sm:$0xff] }
  0x53   :  { %521 = vmatprep.subr.bf16.mxu1 %v520_v43  ;;  %v534_v11 = vpack.c.bf16 %v249_v9, %v248_v8  ;;  %v141_v14 = vld [vmem:[#allocation8 + $0xe0] sm:$0xff]  ;;  %v142_v16 = vld [vmem:[#allocation8 + $0xe8] sm:$0xff]  ;;  %v498_v17 = vpack.c.bf16 %v124_v13, %v123_v12  ;;  %v143_v21 = vld [vmem:[#allocation8 + $0xf0] sm:$0xff] }
  0x54   :  { %v500_v18 = vpack.c.bf16 %v142_v16, %v141_v14  ;;  %v125_v19 = vld [vmem:[#allocation8 + $0x60] sm:$0xff]  ;;  %v126_v20 = vld [vmem:[#allocation8 + $0x68] sm:$0xff]  ;;  %v144_v22 = vld [vmem:[#allocation8 + $0xf8] sm:$0xff] }
  0x55   :  { %487 = vmatpush3.bf16.xpose.msra.mxu0 %v486_v34  ;;  %v502_v23 = vpack.c.bf16 %v126_v20, %v125_v19  ;;  %v504_v24 = vpack.c.bf16 %v144_v22, %v143_v21  ;;  %v127_v25 = vld [vmem:[#allocation8 + $0x70] sm:$0xff]  ;;  %v128_v26 = vld [vmem:[#allocation8 + $0x78] sm:$0xff] }
  0x56   :  { %489 = vmatprep.subr.bf16.mxu0 %v488_v38  ;;  %523 = vmatpush3.bf16.msra.mxu1 %v522_v51  ;;  %v506_v27 = vpack.c.bf16 %v128_v26, %v127_v25  ;;  %v112_v28 = vld [vmem:[#allocation5 + $0x8] sm:$0xff]  ;;  %v266_v29 = vld [vmem:[#allocation10 + $0xf0] sm:$0xff] }
  0x57   :  { %525 = vmatprep.subr.bf16.mxu1 %v524_v53  ;;  %v267_v30 = vld [vmem:[#allocation10 + $0xf8] sm:$0xff]  ;;  %v250_v32 = vld [vmem:[#allocation10 + $0x70] sm:$0xff] }
  0x58   :  { %v536_v31 = vpack.c.bf16 %v267_v30, %v266_v29  ;;  %v251_v33 = vld [vmem:[#allocation10 + $0x78] sm:$0xff]  ;;  %v145_v37 = vld [vmem:[%s98_s19] sm:$0x3] }
  0x59   :  { %v538_v34 = vpack.c.bf16 %v251_v33, %v250_v32  ;;  %v399_v51 = vld [vmem:[%s103_s4] ss:$0 sm:$0xff] }
  0x5a   :  { %527 = vmatpush3.bf16.msra.mxu1 %v526_v59 }
  0x5b   :  { %529 = vmatprep.subr.bf16.mxu1 %v528_v61 }
  0x5d   :  { %491 = vmatpush3.bf16.xpose.msra.mxu0 %v490_v52 }
  0x5e   :  { %493 = vmatprep.subr.bf16.mxu0 %v492_v56  ;;  %531 = vmatpush3.bf16.msra.mxu1 %v530_v5 }
  0x5f   :  { %533 = vmatprep.subr.bf16.mxu1 %v532_v7 }
  0x62   :  { %535 = vmatpush3.bf16.msra.mxu1 %v534_v11 }
  0x63   :  { %537 = vmatprep.subr.bf16.mxu1 %v536_v31 }
  0x65   :  { %495 = vmatpush3.bf16.xpose.msra.mxu0 %v494_v6 }
  0x66   :  { %497 = vmatprep.subr.bf16.mxu0 %v496_v10  ;;  %539 = vmatpush3.bf16.msra.mxu1 %v538_v34 }
  0x6d   :  { %499 = vmatpush3.bf16.xpose.msra.mxu0 %v498_v17 }
  0x6e   :  { %501 = vmatprep.subr.bf16.mxu0 %v500_v18 }
  0x75   :  { %503 = vmatpush3.bf16.xpose.msra.mxu0 %v502_v23 }
  0x76   :  { %505 = vmatprep.subr.bf16.mxu0 %v504_v24 }
  0x7d   :  { %507 = vmatpush3.bf16.xpose.msra.mxu0 %v506_v27 }
  0x84   :  { %435 = vmatmul.mubr.f32.vlgmr.msra.gmra.mrb[0].mxu0 %v741_v15  ;;  %v148_v15 = vshrl.u32 %v147_v35, 7 }
  0x85   :  { %436 = vmatprep.mubr.f32.mxu0 %v112_v28 }
  0x86   :  { %v153_v36 = vsub.s32 1, %v148_v15  ;;  %v149_v38 = vsub.s32 0, %v148_v15 }
  0x88   :  { %437 = vmatmul.mubr.f32.gmra.mrb[2].mxu0 %v112_v28  ;;  %v154_v39 = vrot.slane %v145_v37, %v153_v36  ;;  %v150_v40 = vrot.slane %v145_v37, %v149_v38 }
 0x157   :  { %v223_v41 = vpop.f32.mrb[0].mxu0 }
 0x158   :  { %v225_v42 = vpop.f32.mrb[1].mxu0  ;;  %v224_v44 = vadd.f32 %v223_v41, %v150_v40 }
 0x159   :  { %v226_v43 = vadd.f32 %v225_v42, %v154_v39 }
 0x15b   :  { %v229_v45 = vpop.f32.mrb[2].mxu0  ;;  %332 = vmatprep.mubr.f32.mxu1 %v226_v43 }
 0x15c   :  { %v231_v46 = vpop.f32.mrb[3].mxu0  ;;  %333 = vmatmul.mubr.f32.vlgmr.msra.gmra.mrb[0].mxu1 %v224_v44  ;;  %v230_v48 = vadd.f32 %v229_v45, %v150_v40 }
 0x15d   :  { %v232_v47 = vadd.f32 %v231_v46, %v154_v39 }
 0x15f   :  { %337 = vmatprep.mubr.f32.mxu1 %v232_v47 }
 0x160   :  { %338 = vmatmul.mubr.f32.gmra.mrb[2].mxu1 %v230_v48 }
 0x22f   :  { %v470_v49 = vpop.f32.mrb[0].mxu1 }
 0x230   :  { %v471_v50 = vpop.f32.mrb[1].mxu1 }
 0x231   :  { %v472_v52 = vadd.f32 %v471_v50, %v470_v49 }
 0x233   :  { %v359_v53 = vadd.f32 %v472_v52, %v399_v51  ;;  %v473_v54 = vpop.f32.mrb[2].mxu1 }
 0x234   :  { %v474_v55 = vpop.f32.mrb[3].mxu1 }
 0x235   :  { %361 = vst [vmem:[#allocation11] sm:$0xff] %v359_v53  ;;  %v475_v56 = vadd.f32 %v474_v55, %v473_v54 }
 0x237   :  { %v360_v57 = vadd.f32 %v475_v56, %v399_v51 }
 0x239   :  { %362 = vst [vmem:[#allocation11 + $0x8] sm:$0xff] %v360_v57 }
 0x23a   :  { %627 = shalt.err (!%p624_p9)
}
 0x23b   :  { %s628_s25 = scalar_lea.hbm %s778_s6, 256 }
 0x23c   :  { %p629_p10 = scmp.ne.s32.totalorder %s778_s6, %s628_s25  ;;  %p632_p11 = scmp.lt.u32.totalorder %s628_s25, %s778_s6 }
 0x23e   :  { %p634_p12 = pnand %p632_p11, %p629_p10 }
 0x240   :  { %637 = shalt.err (!%p634_p12)
}
 0x241   :  { %374 = dma.vmem_to_hbm [thread:$0]  %s369_s23, 256, %s778_s6, [#allocation7], %s645_s15, %s645_s15, %s646_s16  }
 0x242   :  { %642 = dma.done.wait [#allocation7], 256  }
 0x243   :  { %643 = vsyncadd [#allocation7], 4294967040 }
 0x244   :  { %378 = vsyncpa [#allocation6], 1 }
 0x245   :  { %379 = vsyncpa [#allocation9], 1 }
 0x246   :  { %380 = vsyncpa [#allocation7], 1 }

</bundles_post_ra>
